<compile_context>
chip_gen: v7x
topology: tpu7x:2x2x1
jax: 0.10.0
libtpu: 0.0.40
codegen_flags: <defaults>
</compile_context>

<pallas_src>
import functools

import jax
import jax.numpy as jnp
from jax.experimental import pallas as pl
from jax.experimental.pallas import tpu as pltpu


# ---------------------------------------------------------------------------
# Packed parameter slab layout (static row offsets, 8-row aligned blocks)
# ---------------------------------------------------------------------------
def _align8(n):
    return ((n + 7) // 8) * 8


def _slab_layout(vocab, hidden, dense):
    gate_w = 4 * hidden
    off_table = 0
    off_whh = off_table + _align8(vocab)
    off_w1 = off_whh + _align8(hidden)
    off_w2 = off_w1 + _align8(hidden)
    off_b1 = off_w2 + _align8(dense)
    off_b2 = off_b1 + 8
    rows = off_b2 + 8
    lanes = max(gate_w, dense, vocab)
    return (off_table, off_whh, off_w1, off_w2, off_b1, off_b2, rows, lanes)


# ---------------------------------------------------------------------------
# Pallas kernel: one-hot embedding/gx lookup + LSTM recurrence + readout MLP
# ---------------------------------------------------------------------------
def _char_lstm_kernel(ids_ref,     # (T*B, 1) int32, time-major token ids
                      state_ref,   # (B, 2H)  f32, [h0 | c0]
                      params_ref,  # (rows, lanes) f32, packed parameter slab
                      out_ref,     # (B, V+2H) f32, [logits | h | c]
                      *, seq_len, batch, hidden, vocab, dense, layout):
    T, B, H, V, D = seq_len, batch, hidden, vocab, dense
    G = 4 * H
    off_tab, off_whh, off_w1, off_w2, off_b1, off_b2, _, _ = layout

    # Static views of the packed parameter slab (single operand, single DMA).
    table = params_ref[off_tab:off_tab + V, 0:G]   # (V,4H) emb@W_ih^T + bias (i/f/o *0.5)
    whh = params_ref[off_whh:off_whh + H, 0:G]     # (H,4H) W_hh^T            (i/f/o *0.5)
    w1 = params_ref[off_w1:off_w1 + H, 0:D]        # (H,D)  linear_1.weight^T
    w2 = params_ref[off_w2:off_w2 + D, 0:V]        # (D,V)  linear_2.weight^T
    b1 = params_ref[off_b1:off_b1 + 1, 0:D]        # (1,D)
    b2 = params_ref[off_b2:off_b2 + 1, 0:V]        # (1,V)

    # Embedding + hoisted input projection: one one-hot @ table MXU dot for
    # the whole window (replaces the XLA gather and 4 hoisted dots).
    ids = ids_ref[...]                                           # (T*B, 1) int32
    onehot = (ids == jax.lax.broadcasted_iota(jnp.int32, (T * B, V), 1)
              ).astype(jnp.float32)                              # (T*B, V)
    gx_all = jnp.dot(onehot, table, preferred_element_type=jnp.float32)  # (T*B, 4H)
    # Per-step rows hoisted out of the serial loop (prologue work).
    gx_steps = [gx_all[t * B:(t + 1) * B, :] for t in range(T)]

    h = state_ref[:, 0:H]
    c = state_ref[:, H:2 * H]

    # Fully unrolled recurrence: per step 1 packed MXU dot, 1 packed tanh
    # (sigmoid-via-tanh trick) and 1 tanh(c); gate split is static lane slices.
    for t in range(T):
        pre = gx_steps[t] + jnp.dot(h, whh, preferred_element_type=jnp.float32)  # (B,4H)
        y = jnp.tanh(pre)                    # i/f/o columns hold tanh(z/2)
        i_g = 0.5 * (y[:, 0:H] + 1.0)        # sigmoid(z) = 0.5*(tanh(z/2)+1)
        f_g = 0.5 * (y[:, H:2 * H] + 1.0)
        g_g = y[:, 2 * H:3 * H]
        o_g = 0.5 * (y[:, 3 * H:4 * H] + 1.0)
        c = f_g * c + i_g * g_g
        h = o_g * jnp.tanh(c)

    # Readout MLP (n_layers == 1, so h.mean(dim=0) over layers is identity).
    dense_act = jnp.dot(h, w1, preferred_element_type=jnp.float32) + b1
    logits = jnp.dot(dense_act, w2, preferred_element_type=jnp.float32) + b2

    # Single merged output buffer: [logits | h | c].
    out_ref[:, 0:V] = logits
    out_ref[:, V:V + H] = h
    out_ref[:, V + H:V + 2 * H] = c


def _run_char_lstm(ids, state, slab, *, seq_len, batch, hidden, vocab, dense,
                   layout):
    B, H, V = batch, hidden, vocab
    vmem = pl.BlockSpec(memory_space=pltpu.MemorySpace.VMEM)
    kernel = functools.partial(_char_lstm_kernel, seq_len=seq_len, batch=batch,
                               hidden=hidden, vocab=vocab, dense=dense,
                               layout=layout)
    # Whole problem is ~10 KiB: grid-less, fully VMEM resident, 3 input DMAs,
    # 1 output DMA. No tiling / no cross-core split (serial recurrence, B=2).
    return pl.pallas_call(
        kernel,
        out_shape=jax.ShapeDtypeStruct((B, V + 2 * H), jnp.float32),
        in_specs=[vmem, vmem, vmem],
        out_specs=vmem,
    )(ids, state, slab)


# ---------------------------------------------------------------------------
# Module wrapper
# ---------------------------------------------------------------------------
class CharacterEmbeddingPallas:
    def __init__(self, vocab_size, embedding_dim=2, dense_dim=32, hidden_dim=8,
                 max_norm=2, n_layers=1, key=None):
        assert n_layers == 1, "kernel implements a single LSTM layer"
        self.vocab_size = vocab_size
        self.embedding_dim = embedding_dim
        self.dense_dim = dense_dim
        self.hidden_dim = hidden_dim
        self.max_norm = float(max_norm)
        self.n_layers = n_layers

        key = jax.random.PRNGKey(0) if key is None else key
        ks = jax.random.split(key, 9)
        V, E, H, D = vocab_size, embedding_dim, hidden_dim, dense_dim

        # Embedding (padding_idx = V-1 row zeroed, like PyTorch init).
        emb_w = jax.random.normal(ks[0], (V, E), jnp.float32)
        self.emb_weight = emb_w.at[V - 1].set(0.0)

        # LSTM params, PyTorch gate order (i, f, g, o).
        s = 1.0 / jnp.sqrt(H)
        self.w_ih = jax.random.uniform(ks[1], (4 * H, E), jnp.float32, -s, s)
        self.w_hh = jax.random.uniform(ks[2], (4 * H, H), jnp.float32, -s, s)
        self.b_ih = jax.random.uniform(ks[3], (4 * H,), jnp.float32, -s, s)
        self.b_hh = jax.random.uniform(ks[4], (4 * H,), jnp.float32, -s, s)

        # Dense layers (PyTorch-style uniform init).
        s1 = 1.0 / jnp.sqrt(H)
        self.w1 = jax.random.uniform(ks[5], (D, H), jnp.float32, -s1, s1)
        self.b1 = jax.random.uniform(ks[6], (D,), jnp.float32, -s1, s1)
        s2 = 1.0 / jnp.sqrt(D)
        self.w2 = jax.random.uniform(ks[7], (V, D), jnp.float32, -s2, s2)
        self.b2 = jax.random.uniform(ks[8], (V,), jnp.float32, -s2, s2)

        # ---- precompute the packed parameter slab (all repacking hoisted out
        # of __call__) -------------------------------------------------------
        # Embedding max_norm renorm (functional whole-table variant).
        # TODO(synk): PyTorch renormalizes only looked-up rows *in place*
        # (stateful weight mutation); forward outputs are identical here.
        norms = jnp.linalg.norm(self.emb_weight, axis=1, keepdims=True)
        scale = jnp.where(norms > self.max_norm,
                          self.max_norm / jnp.maximum(norms, 1e-12), 1.0)
        emb_renorm = self.emb_weight * scale                           # (V, E)

        # gx_table[v] = emb[v] @ W_ih^T + (b_ih + b_hh)   -> (V, 4H)
        gx_table = emb_renorm @ self.w_ih.T + (self.b_ih + self.b_hh)[None, :]
        whh_packed = self.w_hh.T                                       # (H, 4H)

        # Pre-scale i/f/o gate columns by 0.5 (sigmoid(z) = 0.5*(tanh(z/2)+1)).
        col_scale = jnp.concatenate(
            [jnp.full((H,), 0.5), jnp.full((H,), 0.5),
             jnp.ones((H,)), jnp.full((H,), 0.5)]).astype(jnp.float32)
        gx_table = gx_table * col_scale[None, :]
        whh_packed = whh_packed * col_scale[None, :]

        layout = _slab_layout(V, H, D)
        (off_tab, off_whh, off_w1, off_w2, off_b1, off_b2, rows, lanes) = layout
        slab = jnp.zeros((rows, lanes), jnp.float32)
        slab = slab.at[off_tab:off_tab + V, 0:4 * H].set(gx_table)
        slab = slab.at[off_whh:off_whh + H, 0:4 * H].set(whh_packed)
        slab = slab.at[off_w1:off_w1 + H, 0:D].set(self.w1.T)
        slab = slab.at[off_w2:off_w2 + D, 0:V].set(self.w2.T)
        slab = slab.at[off_b1, 0:D].set(self.b1)
        slab = slab.at[off_b2, 0:V].set(self.b2)
        self.param_slab = slab
        self._layout = layout

    @functools.partial(jax.jit, static_argnums=0)
    def __call__(self, x, h=None, c=None):
        B, T = x.shape
        H, V = self.hidden_dim, self.vocab_size

        # Time-major token ids (t*B + b) as a single tiny int column.
        ids = jnp.transpose(x).reshape(T * B, 1).astype(jnp.int32)

        if h is not None and c is not None:
            state = jnp.concatenate([h[0], c[0]], axis=1).astype(jnp.float32)
        else:
            state = jnp.zeros((B, 2 * H), jnp.float32)

        out = _run_char_lstm(ids, state, self.param_slab,
                             seq_len=T, batch=B, hidden=H, vocab=V,
                             dense=self.dense_dim, layout=self._layout)

        logits = out[:, 0:V]
        h_fin = out[:, V:V + H]
        c_fin = out[:, V + H:V + 2 * H]
        return logits, h_fin[None], c_fin[None]     # h, c: (n_layers, B, H)


# ---------------------------------------------------------------------------
# Pure-JAX reference (for self-check)
# ---------------------------------------------------------------------------
def _reference(model, x, h0=None, c0=None):
    norms = jnp.linalg.norm(model.emb_weight, axis=1, keepdims=True)
    scale = jnp.where(norms > model.max_norm,
                      model.max_norm / jnp.maximum(norms, 1e-12), 1.0)
    w = model.emb_weight * scale
    emb = jnp.take(w, x, axis=0)                      # (B, T, E)

    B, T, _ = emb.shape
    H = model.hidden_dim
    h = jnp.zeros((B, H), jnp.float32) if h0 is None else h0[0]
    c = jnp.zeros((B, H), jnp.float32) if c0 is None else c0[0]
    for t in range(T):
        g = emb[:, t, :] @ model.w_ih.T + h @ model.w_hh.T + model.b_ih + model.b_hh
        i_g = jax.nn.sigmoid(g[:, 0 * H:1 * H])
        f_g = jax.nn.sigmoid(g[:, 1 * H:2 * H])
        g_g = jnp.tanh(g[:, 2 * H:3 * H])
        o_g = jax.nn.sigmoid(g[:, 3 * H:4 * H])
        c = f_g * c + i_g * g_g
        h = o_g * jnp.tanh(c)
    dense = h @ model.w1.T + model.b1
    logits = dense @ model.w2.T + model.b2
    return logits, h[None], c[None]


if __name__ == "__main__":
    vocab_size = 16
    batch, window = 2, 8

    model = CharacterEmbeddingPallas(vocab_size, embedding_dim=2, dense_dim=32,
                                     hidden_dim=8, max_norm=2, n_layers=1,
                                     key=jax.random.PRNGKey(0))

    x = jax.random.randint(jax.random.PRNGKey(1), (batch, window), 0, vocab_size,
                           dtype=jnp.int32)

    # Default (zero) initial state.
    logits, h, c = model(x)
    jax.block_until_ready((logits, h, c))

    ref_logits, ref_h, ref_c = _reference(model, x)
    assert logits.shape == (batch, vocab_size)
    assert h.shape == (1, batch, 8) and c.shape == (1, batch, 8)
    assert jnp.allclose(logits, ref_logits, rtol=1e-4, atol=5e-5)
    assert jnp.allclose(h, ref_h, rtol=1e-4, atol=5e-5)
    assert jnp.allclose(c, ref_c, rtol=1e-4, atol=5e-5)

    # Second step feeding the state back (decode-style), exercises h/c path.
    x2 = jax.random.randint(jax.random.PRNGKey(2), (batch, window), 0, vocab_size,
                            dtype=jnp.int32)
    logits2, h2, c2 = model(x2, h, c)
    jax.block_until_ready((logits2, h2, c2))
    r_logits2, r_h2, r_c2 = _reference(model, x2, ref_h, ref_c)
    assert jnp.allclose(logits2, r_logits2, rtol=1e-4, atol=1e-4)
    assert jnp.allclose(h2, r_h2, rtol=1e-4, atol=1e-4)
    assert jnp.allclose(c2, r_c2, rtol=1e-4, atol=1e-4)

    print("KERNEL_OK")
</pallas_src>

<mosaic_0001>
module attributes {stable_mosaic.version = 11 : i64} {
  func.func @_char_lstm_kernel(%arg0: memref<16x1xi32, #tpu.memory_space<vmem>>, %arg1: memref<2x16xf32, #tpu.memory_space<vmem>>, %arg2: memref<80x32xf32, #tpu.memory_space<vmem>>, %arg3: memref<2x32xf32, #tpu.memory_space<vmem>>) attributes {dimension_semantics = [], scalar_prefetch = 0 : i64, scratch_operands = 0 : i64, tpu.core_type = #tpu.core_type<tc>} {
    %c0 = arith.constant 0 : index
    %c0_0 = arith.constant 0 : index
    %0 = vector.load %arg2[%c0, %c0_0] : memref<80x32xf32, #tpu.memory_space<vmem>>, vector<16x32xf32>
    %c16 = arith.constant 16 : index
    %c0_1 = arith.constant 0 : index
    %1 = vector.load %arg2[%c16, %c0_1] : memref<80x32xf32, #tpu.memory_space<vmem>>, vector<8x32xf32>
    %c24 = arith.constant 24 : index
    %c0_2 = arith.constant 0 : index
    %2 = vector.load %arg2[%c24, %c0_2] : memref<80x32xf32, #tpu.memory_space<vmem>>, vector<8x32xf32>
    %c32 = arith.constant 32 : index
    %c0_3 = arith.constant 0 : index
    %3 = vector.load %arg2[%c32, %c0_3] : memref<80x32xf32, #tpu.memory_space<vmem>>, vector<32x16xf32>
    %c64 = arith.constant 64 : index
    %c0_4 = arith.constant 0 : index
    %4 = vector.load %arg2[%c64, %c0_4] : memref<80x32xf32, #tpu.memory_space<vmem>>, vector<1x32xf32>
    %c72 = arith.constant 72 : index
    %c0_5 = arith.constant 0 : index
    %5 = vector.load %arg2[%c72, %c0_5] : memref<80x32xf32, #tpu.memory_space<vmem>>, vector<1x16xf32>
    %c0_6 = arith.constant 0 : index
    %c0_7 = arith.constant 0 : index
    %6 = vector.load %arg0[%c0_6, %c0_7] : memref<16x1xi32, #tpu.memory_space<vmem>>, vector<16x1xi32>
    %7 = tpu.iota {dimensions = array<i32: 1>} : vector<16x16xi32>
    %8 = vector.broadcast %6 : vector<16x1xi32> to vector<16x16xi32>
    %9 = arith.cmpi eq, %8, %7 : vector<16x16xi32>
    %10 = arith.extui %9 : vector<16x16xi1> to vector<16x16xi32>
    %11 = arith.sitofp %10 : vector<16x16xi32> to vector<16x16xf32>
    %cst = arith.constant dense<0.000000e+00> : vector<16x32xf32>
    %12 = tpu.matmul %11, %0, %cst {dimension_numbers = #tpu.dot_dimension_numbers<[1], [0], [0], [1], [0, 0, 1, 1], [], []>} : vector<16x16xf32>, vector<16x32xf32>, vector<16x32xf32> -> vector<16x32xf32>
    %13 = vector.extract_strided_slice %12 {offsets = [0, 0], sizes = [2, 32], strides = [1, 1]} : vector<16x32xf32> to vector<2x32xf32>
    %14 = vector.extract_strided_slice %12 {offsets = [2, 0], sizes = [2, 32], strides = [1, 1]} : vector<16x32xf32> to vector<2x32xf32>
    %15 = vector.extract_strided_slice %12 {offsets = [4, 0], sizes = [2, 32], strides = [1, 1]} : vector<16x32xf32> to vector<2x32xf32>
    %16 = vector.extract_strided_slice %12 {offsets = [6, 0], sizes = [2, 32], strides = [1, 1]} : vector<16x32xf32> to vector<2x32xf32>
    %17 = vector.extract_strided_slice %12 {offsets = [8, 0], sizes = [2, 32], strides = [1, 1]} : vector<16x32xf32> to vector<2x32xf32>
    %18 = vector.extract_strided_slice %12 {offsets = [10, 0], sizes = [2, 32], strides = [1, 1]} : vector<16x32xf32> to vector<2x32xf32>
    %19 = vector.extract_strided_slice %12 {offsets = [12, 0], sizes = [2, 32], strides = [1, 1]} : vector<16x32xf32> to vector<2x32xf32>
    %20 = vector.extract_strided_slice %12 {offsets = [14, 0], sizes = [2, 32], strides = [1, 1]} : vector<16x32xf32> to vector<2x32xf32>
    %c0_8 = arith.constant 0 : index
    %c0_9 = arith.constant 0 : index
    %21 = vector.load %arg1[%c0_8, %c0_9] : memref<2x16xf32, #tpu.memory_space<vmem>>, vector<2x8xf32>
    %c0_10 = arith.constant 0 : index
    %c8 = arith.constant 8 : index
    %22 = vector.load %arg1[%c0_10, %c8] : memref<2x16xf32, #tpu.memory_space<vmem>>, vector<2x8xf32>
    %cst_11 = arith.constant dense<0.000000e+00> : vector<2x32xf32>
    %23 = tpu.matmul %21, %1, %cst_11 {dimension_numbers = #tpu.dot_dimension_numbers<[1], [0], [0], [1], [0, 0, 1, 1], [], []>} : vector<2x8xf32>, vector<8x32xf32>, vector<2x32xf32> -> vector<2x32xf32>
    %24 = arith.addf %13, %23 : vector<2x32xf32>
    %25 = math.tanh %24 : vector<2x32xf32>
    %26 = vector.extract_strided_slice %25 {offsets = [0, 0], sizes = [2, 8], strides = [1, 1]} : vector<2x32xf32> to vector<2x8xf32>
    %cst_12 = arith.constant 1.000000e+00 : f32
    %27 = vector.broadcast %cst_12 : f32 to vector<2x8xf32>
    %28 = arith.addf %26, %27 : vector<2x8xf32>
    %cst_13 = arith.constant 5.000000e-01 : f32
    %29 = vector.broadcast %cst_13 : f32 to vector<2x8xf32>
    %30 = arith.mulf %29, %28 : vector<2x8xf32>
    %31 = vector.extract_strided_slice %25 {offsets = [0, 8], sizes = [2, 8], strides = [1, 1]} : vector<2x32xf32> to vector<2x8xf32>
    %cst_14 = arith.constant 1.000000e+00 : f32
    %32 = vector.broadcast %cst_14 : f32 to vector<2x8xf32>
    %33 = arith.addf %31, %32 : vector<2x8xf32>
    %cst_15 = arith.constant 5.000000e-01 : f32
    %34 = vector.broadcast %cst_15 : f32 to vector<2x8xf32>
    %35 = arith.mulf %34, %33 : vector<2x8xf32>
    %36 = vector.extract_strided_slice %25 {offsets = [0, 16], sizes = [2, 8], strides = [1, 1]} : vector<2x32xf32> to vector<2x8xf32>
    %37 = vector.extract_strided_slice %25 {offsets = [0, 24], sizes = [2, 8], strides = [1, 1]} : vector<2x32xf32> to vector<2x8xf32>
    %cst_16 = arith.constant 1.000000e+00 : f32
    %38 = vector.broadcast %cst_16 : f32 to vector<2x8xf32>
    %39 = arith.addf %37, %38 : vector<2x8xf32>
    %cst_17 = arith.constant 5.000000e-01 : f32
    %40 = vector.broadcast %cst_17 : f32 to vector<2x8xf32>
    %41 = arith.mulf %40, %39 : vector<2x8xf32>
    %42 = arith.mulf %35, %22 : vector<2x8xf32>
    %43 = arith.mulf %30, %36 : vector<2x8xf32>
    %44 = arith.addf %42, %43 : vector<2x8xf32>
    %45 = math.tanh %44 : vector<2x8xf32>
    %46 = arith.mulf %41, %45 : vector<2x8xf32>
    %cst_18 = arith.constant dense<0.000000e+00> : vector<2x32xf32>
    %47 = tpu.matmul %46, %1, %cst_18 {dimension_numbers = #tpu.dot_dimension_numbers<[1], [0], [0], [1], [0, 0, 1, 1], [], []>} : vector<2x8xf32>, vector<8x32xf32>, vector<2x32xf32> -> vector<2x32xf32>
    %48 = arith.addf %14, %47 : vector<2x32xf32>
    %49 = math.tanh %48 : vector<2x32xf32>
    %50 = vector.extract_strided_slice %49 {offsets = [0, 0], sizes = [2, 8], strides = [1, 1]} : vector<2x32xf32> to vector<2x8xf32>
    %cst_19 = arith.constant 1.000000e+00 : f32
    %51 = vector.broadcast %cst_19 : f32 to vector<2x8xf32>
    %52 = arith.addf %50, %51 : vector<2x8xf32>
    %cst_20 = arith.constant 5.000000e-01 : f32
    %53 = vector.broadcast %cst_20 : f32 to vector<2x8xf32>
    %54 = arith.mulf %53, %52 : vector<2x8xf32>
    %55 = vector.extract_strided_slice %49 {offsets = [0, 8], sizes = [2, 8], strides = [1, 1]} : vector<2x32xf32> to vector<2x8xf32>
    %cst_21 = arith.constant 1.000000e+00 : f32
    %56 = vector.broadcast %cst_21 : f32 to vector<2x8xf32>
    %57 = arith.addf %55, %56 : vector<2x8xf32>
    %cst_22 = arith.constant 5.000000e-01 : f32
    %58 = vector.broadcast %cst_22 : f32 to vector<2x8xf32>
    %59 = arith.mulf %58, %57 : vector<2x8xf32>
    %60 = vector.extract_strided_slice %49 {offsets = [0, 16], sizes = [2, 8], strides = [1, 1]} : vector<2x32xf32> to vector<2x8xf32>
    %61 = vector.extract_strided_slice %49 {offsets = [0, 24], sizes = [2, 8], strides = [1, 1]} : vector<2x32xf32> to vector<2x8xf32>
    %cst_23 = arith.constant 1.000000e+00 : f32
    %62 = vector.broadcast %cst_23 : f32 to vector<2x8xf32>
    %63 = arith.addf %61, %62 : vector<2x8xf32>
    %cst_24 = arith.constant 5.000000e-01 : f32
    %64 = vector.broadcast %cst_24 : f32 to vector<2x8xf32>
    %65 = arith.mulf %64, %63 : vector<2x8xf32>
    %66 = arith.mulf %59, %44 : vector<2x8xf32>
    %67 = arith.mulf %54, %60 : vector<2x8xf32>
    %68 = arith.addf %66, %67 : vector<2x8xf32>
    %69 = math.tanh %68 : vector<2x8xf32>
    %70 = arith.mulf %65, %69 : vector<2x8xf32>
    %cst_25 = arith.constant dense<0.000000e+00> : vector<2x32xf32>
    %71 = tpu.matmul %70, %1, %cst_25 {dimension_numbers = #tpu.dot_dimension_numbers<[1], [0], [0], [1], [0, 0, 1, 1], [], []>} : vector<2x8xf32>, vector<8x32xf32>, vector<2x32xf32> -> vector<2x32xf32>
    %72 = arith.addf %15, %71 : vector<2x32xf32>
    %73 = math.tanh %72 : vector<2x32xf32>
    %74 = vector.extract_strided_slice %73 {offsets = [0, 0], sizes = [2, 8], strides = [1, 1]} : vector<2x32xf32> to vector<2x8xf32>
    %cst_26 = arith.constant 1.000000e+00 : f32
    %75 = vector.broadcast %cst_26 : f32 to vector<2x8xf32>
    %76 = arith.addf %74, %75 : vector<2x8xf32>
    %cst_27 = arith.constant 5.000000e-01 : f32
    %77 = vector.broadcast %cst_27 : f32 to vector<2x8xf32>
    %78 = arith.mulf %77, %76 : vector<2x8xf32>
    %79 = vector.extract_strided_slice %73 {offsets = [0, 8], sizes = [2, 8], strides = [1, 1]} : vector<2x32xf32> to vector<2x8xf32>
    %cst_28 = arith.constant 1.000000e+00 : f32
    %80 = vector.broadcast %cst_28 : f32 to vector<2x8xf32>
    %81 = arith.addf %79, %80 : vector<2x8xf32>
    %cst_29 = arith.constant 5.000000e-01 : f32
    %82 = vector.broadcast %cst_29 : f32 to vector<2x8xf32>
    %83 = arith.mulf %82, %81 : vector<2x8xf32>
    %84 = vector.extract_strided_slice %73 {offsets = [0, 16], sizes = [2, 8], strides = [1, 1]} : vector<2x32xf32> to vector<2x8xf32>
    %85 = vector.extract_strided_slice %73 {offsets = [0, 24], sizes = [2, 8], strides = [1, 1]} : vector<2x32xf32> to vector<2x8xf32>
    %cst_30 = arith.constant 1.000000e+00 : f32
    %86 = vector.broadcast %cst_30 : f32 to vector<2x8xf32>
    %87 = arith.addf %85, %86 : vector<2x8xf32>
    %cst_31 = arith.constant 5.000000e-01 : f32
    %88 = vector.broadcast %cst_31 : f32 to vector<2x8xf32>
    %89 = arith.mulf %88, %87 : vector<2x8xf32>
    %90 = arith.mulf %83, %68 : vector<2x8xf32>
    %91 = arith.mulf %78, %84 : vector<2x8xf32>
    %92 = arith.addf %90, %91 : vector<2x8xf32>
    %93 = math.tanh %92 : vector<2x8xf32>
    %94 = arith.mulf %89, %93 : vector<2x8xf32>
    %cst_32 = arith.constant dense<0.000000e+00> : vector<2x32xf32>
    %95 = tpu.matmul %94, %1, %cst_32 {dimension_numbers = #tpu.dot_dimension_numbers<[1], [0], [0], [1], [0, 0, 1, 1], [], []>} : vector<2x8xf32>, vector<8x32xf32>, vector<2x32xf32> -> vector<2x32xf32>
    %96 = arith.addf %16, %95 : vector<2x32xf32>
    %97 = math.tanh %96 : vector<2x32xf32>
    %98 = vector.extract_strided_slice %97 {offsets = [0, 0], sizes = [2, 8], strides = [1, 1]} : vector<2x32xf32> to vector<2x8xf32>
    %cst_33 = arith.constant 1.000000e+00 : f32
    %99 = vector.broadcast %cst_33 : f32 to vector<2x8xf32>
    %100 = arith.addf %98, %99 : vector<2x8xf32>
    %cst_34 = arith.constant 5.000000e-01 : f32
    %101 = vector.broadcast %cst_34 : f32 to vector<2x8xf32>
    %102 = arith.mulf %101, %100 : vector<2x8xf32>
    %103 = vector.extract_strided_slice %97 {offsets = [0, 8], sizes = [2, 8], strides = [1, 1]} : vector<2x32xf32> to vector<2x8xf32>
    %cst_35 = arith.constant 1.000000e+00 : f32
    %104 = vector.broadcast %cst_35 : f32 to vector<2x8xf32>
    %105 = arith.addf %103, %104 : vector<2x8xf32>
    %cst_36 = arith.constant 5.000000e-01 : f32
    %106 = vector.broadcast %cst_36 : f32 to vector<2x8xf32>
    %107 = arith.mulf %106, %105 : vector<2x8xf32>
    %108 = vector.extract_strided_slice %97 {offsets = [0, 16], sizes = [2, 8], strides = [1, 1]} : vector<2x32xf32> to vector<2x8xf32>
    %109 = vector.extract_strided_slice %97 {offsets = [0, 24], sizes = [2, 8], strides = [1, 1]} : vector<2x32xf32> to vector<2x8xf32>
    %cst_37 = arith.constant 1.000000e+00 : f32
    %110 = vector.broadcast %cst_37 : f32 to vector<2x8xf32>
    %111 = arith.addf %109, %110 : vector<2x8xf32>
    %cst_38 = arith.constant 5.000000e-01 : f32
    %112 = vector.broadcast %cst_38 : f32 to vector<2x8xf32>
    %113 = arith.mulf %112, %111 : vector<2x8xf32>
    %114 = arith.mulf %107, %92 : vector<2x8xf32>
    %115 = arith.mulf %102, %108 : vector<2x8xf32>
    %116 = arith.addf %114, %115 : vector<2x8xf32>
    %117 = math.tanh %116 : vector<2x8xf32>
    %118 = arith.mulf %113, %117 : vector<2x8xf32>
    %cst_39 = arith.constant dense<0.000000e+00> : vector<2x32xf32>
    %119 = tpu.matmul %118, %1, %cst_39 {dimension_numbers = #tpu.dot_dimension_numbers<[1], [0], [0], [1], [0, 0, 1, 1], [], []>} : vector<2x8xf32>, vector<8x32xf32>, vector<2x32xf32> -> vector<2x32xf32>
    %120 = arith.addf %17, %119 : vector<2x32xf32>
    %121 = math.tanh %120 : vector<2x32xf32>
    %122 = vector.extract_strided_slice %121 {offsets = [0, 0], sizes = [2, 8], strides = [1, 1]} : vector<2x32xf32> to vector<2x8xf32>
    %cst_40 = arith.constant 1.000000e+00 : f32
    %123 = vector.broadcast %cst_40 : f32 to vector<2x8xf32>
    %124 = arith.addf %122, %123 : vector<2x8xf32>
    %cst_41 = arith.constant 5.000000e-01 : f32
    %125 = vector.broadcast %cst_41 : f32 to vector<2x8xf32>
    %126 = arith.mulf %125, %124 : vector<2x8xf32>
    %127 = vector.extract_strided_slice %121 {offsets = [0, 8], sizes = [2, 8], strides = [1, 1]} : vector<2x32xf32> to vector<2x8xf32>
    %cst_42 = arith.constant 1.000000e+00 : f32
    %128 = vector.broadcast %cst_42 : f32 to vector<2x8xf32>
    %129 = arith.addf %127, %128 : vector<2x8xf32>
    %cst_43 = arith.constant 5.000000e-01 : f32
    %130 = vector.broadcast %cst_43 : f32 to vector<2x8xf32>
    %131 = arith.mulf %130, %129 : vector<2x8xf32>
    %132 = vector.extract_strided_slice %121 {offsets = [0, 16], sizes = [2, 8], strides = [1, 1]} : vector<2x32xf32> to vector<2x8xf32>
    %133 = vector.extract_strided_slice %121 {offsets = [0, 24], sizes = [2, 8], strides = [1, 1]} : vector<2x32xf32> to vector<2x8xf32>
    %cst_44 = arith.constant 1.000000e+00 : f32
    %134 = vector.broadcast %cst_44 : f32 to vector<2x8xf32>
    %135 = arith.addf %133, %134 : vector<2x8xf32>
    %cst_45 = arith.constant 5.000000e-01 : f32
    %136 = vector.broadcast %cst_45 : f32 to vector<2x8xf32>
    %137 = arith.mulf %136, %135 : vector<2x8xf32>
    %138 = arith.mulf %131, %116 : vector<2x8xf32>
    %139 = arith.mulf %126, %132 : vector<2x8xf32>
    %140 = arith.addf %138, %139 : vector<2x8xf32>
    %141 = math.tanh %140 : vector<2x8xf32>
    %142 = arith.mulf %137, %141 : vector<2x8xf32>
    %cst_46 = arith.constant dense<0.000000e+00> : vector<2x32xf32>
    %143 = tpu.matmul %142, %1, %cst_46 {dimension_numbers = #tpu.dot_dimension_numbers<[1], [0], [0], [1], [0, 0, 1, 1], [], []>} : vector<2x8xf32>, vector<8x32xf32>, vector<2x32xf32> -> vector<2x32xf32>
    %144 = arith.addf %18, %143 : vector<2x32xf32>
    %145 = math.tanh %144 : vector<2x32xf32>
    %146 = vector.extract_strided_slice %145 {offsets = [0, 0], sizes = [2, 8], strides = [1, 1]} : vector<2x32xf32> to vector<2x8xf32>
    %cst_47 = arith.constant 1.000000e+00 : f32
    %147 = vector.broadcast %cst_47 : f32 to vector<2x8xf32>
    %148 = arith.addf %146, %147 : vector<2x8xf32>
    %cst_48 = arith.constant 5.000000e-01 : f32
    %149 = vector.broadcast %cst_48 : f32 to vector<2x8xf32>
    %150 = arith.mulf %149, %148 : vector<2x8xf32>
    %151 = vector.extract_strided_slice %145 {offsets = [0, 8], sizes = [2, 8], strides = [1, 1]} : vector<2x32xf32> to vector<2x8xf32>
    %cst_49 = arith.constant 1.000000e+00 : f32
    %152 = vector.broadcast %cst_49 : f32 to vector<2x8xf32>
    %153 = arith.addf %151, %152 : vector<2x8xf32>
    %cst_50 = arith.constant 5.000000e-01 : f32
    %154 = vector.broadcast %cst_50 : f32 to vector<2x8xf32>
    %155 = arith.mulf %154, %153 : vector<2x8xf32>
    %156 = vector.extract_strided_slice %145 {offsets = [0, 16], sizes = [2, 8], strides = [1, 1]} : vector<2x32xf32> to vector<2x8xf32>
    %157 = vector.extract_strided_slice %145 {offsets = [0, 24], sizes = [2, 8], strides = [1, 1]} : vector<2x32xf32> to vector<2x8xf32>
    %cst_51 = arith.constant 1.000000e+00 : f32
    %158 = vector.broadcast %cst_51 : f32 to vector<2x8xf32>
    %159 = arith.addf %157, %158 : vector<2x8xf32>
    %cst_52 = arith.constant 5.000000e-01 : f32
    %160 = vector.broadcast %cst_52 : f32 to vector<2x8xf32>
    %161 = arith.mulf %160, %159 : vector<2x8xf32>
    %162 = arith.mulf %155, %140 : vector<2x8xf32>
    %163 = arith.mulf %150, %156 : vector<2x8xf32>
    %164 = arith.addf %162, %163 : vector<2x8xf32>
    %165 = math.tanh %164 : vector<2x8xf32>
    %166 = arith.mulf %161, %165 : vector<2x8xf32>
    %cst_53 = arith.constant dense<0.000000e+00> : vector<2x32xf32>
    %167 = tpu.matmul %166, %1, %cst_53 {dimension_numbers = #tpu.dot_dimension_numbers<[1], [0], [0], [1], [0, 0, 1, 1], [], []>} : vector<2x8xf32>, vector<8x32xf32>, vector<2x32xf32> -> vector<2x32xf32>
    %168 = arith.addf %19, %167 : vector<2x32xf32>
    %169 = math.tanh %168 : vector<2x32xf32>
    %170 = vector.extract_strided_slice %169 {offsets = [0, 0], sizes = [2, 8], strides = [1, 1]} : vector<2x32xf32> to vector<2x8xf32>
    %cst_54 = arith.constant 1.000000e+00 : f32
    %171 = vector.broadcast %cst_54 : f32 to vector<2x8xf32>
    %172 = arith.addf %170, %171 : vector<2x8xf32>
    %cst_55 = arith.constant 5.000000e-01 : f32
    %173 = vector.broadcast %cst_55 : f32 to vector<2x8xf32>
    %174 = arith.mulf %173, %172 : vector<2x8xf32>
    %175 = vector.extract_strided_slice %169 {offsets = [0, 8], sizes = [2, 8], strides = [1, 1]} : vector<2x32xf32> to vector<2x8xf32>
    %cst_56 = arith.constant 1.000000e+00 : f32
    %176 = vector.broadcast %cst_56 : f32 to vector<2x8xf32>
    %177 = arith.addf %175, %176 : vector<2x8xf32>
    %cst_57 = arith.constant 5.000000e-01 : f32
    %178 = vector.broadcast %cst_57 : f32 to vector<2x8xf32>
    %179 = arith.mulf %178, %177 : vector<2x8xf32>
    %180 = vector.extract_strided_slice %169 {offsets = [0, 16], sizes = [2, 8], strides = [1, 1]} : vector<2x32xf32> to vector<2x8xf32>
    %181 = vector.extract_strided_slice %169 {offsets = [0, 24], sizes = [2, 8], strides = [1, 1]} : vector<2x32xf32> to vector<2x8xf32>
    %cst_58 = arith.constant 1.000000e+00 : f32
    %182 = vector.broadcast %cst_58 : f32 to vector<2x8xf32>
    %183 = arith.addf %181, %182 : vector<2x8xf32>
    %cst_59 = arith.constant 5.000000e-01 : f32
    %184 = vector.broadcast %cst_59 : f32 to vector<2x8xf32>
    %185 = arith.mulf %184, %183 : vector<2x8xf32>
    %186 = arith.mulf %179, %164 : vector<2x8xf32>
    %187 = arith.mulf %174, %180 : vector<2x8xf32>
    %188 = arith.addf %186, %187 : vector<2x8xf32>
    %189 = math.tanh %188 : vector<2x8xf32>
    %190 = arith.mulf %185, %189 : vector<2x8xf32>
    %cst_60 = arith.constant dense<0.000000e+00> : vector<2x32xf32>
    %191 = tpu.matmul %190, %1, %cst_60 {dimension_numbers = #tpu.dot_dimension_numbers<[1], [0], [0], [1], [0, 0, 1, 1], [], []>} : vector<2x8xf32>, vector<8x32xf32>, vector<2x32xf32> -> vector<2x32xf32>
    %192 = arith.addf %20, %191 : vector<2x32xf32>
    %193 = math.tanh %192 : vector<2x32xf32>
    %194 = vector.extract_strided_slice %193 {offsets = [0, 0], sizes = [2, 8], strides = [1, 1]} : vector<2x32xf32> to vector<2x8xf32>
    %cst_61 = arith.constant 1.000000e+00 : f32
    %195 = vector.broadcast %cst_61 : f32 to vector<2x8xf32>
    %196 = arith.addf %194, %195 : vector<2x8xf32>
    %cst_62 = arith.constant 5.000000e-01 : f32
    %197 = vector.broadcast %cst_62 : f32 to vector<2x8xf32>
    %198 = arith.mulf %197, %196 : vector<2x8xf32>
    %199 = vector.extract_strided_slice %193 {offsets = [0, 8], sizes = [2, 8], strides = [1, 1]} : vector<2x32xf32> to vector<2x8xf32>
    %cst_63 = arith.constant 1.000000e+00 : f32
    %200 = vector.broadcast %cst_63 : f32 to vector<2x8xf32>
    %201 = arith.addf %199, %200 : vector<2x8xf32>
    %cst_64 = arith.constant 5.000000e-01 : f32
    %202 = vector.broadcast %cst_64 : f32 to vector<2x8xf32>
    %203 = arith.mulf %202, %201 : vector<2x8xf32>
    %204 = vector.extract_strided_slice %193 {offsets = [0, 16], sizes = [2, 8], strides = [1, 1]} : vector<2x32xf32> to vector<2x8xf32>
    %205 = vector.extract_strided_slice %193 {offsets = [0, 24], sizes = [2, 8], strides = [1, 1]} : vector<2x32xf32> to vector<2x8xf32>
    %cst_65 = arith.constant 1.000000e+00 : f32
    %206 = vector.broadcast %cst_65 : f32 to vector<2x8xf32>
    %207 = arith.addf %205, %206 : vector<2x8xf32>
    %cst_66 = arith.constant 5.000000e-01 : f32
    %208 = vector.broadcast %cst_66 : f32 to vector<2x8xf32>
    %209 = arith.mulf %208, %207 : vector<2x8xf32>
    %210 = arith.mulf %203, %188 : vector<2x8xf32>
    %211 = arith.mulf %198, %204 : vector<2x8xf32>
    %212 = arith.addf %210, %211 : vector<2x8xf32>
    %213 = math.tanh %212 : vector<2x8xf32>
    %214 = arith.mulf %209, %213 : vector<2x8xf32>
    %cst_67 = arith.constant dense<0.000000e+00> : vector<2x32xf32>
    %215 = tpu.matmul %214, %2, %cst_67 {dimension_numbers = #tpu.dot_dimension_numbers<[1], [0], [0], [1], [0, 0, 1, 1], [], []>} : vector<2x8xf32>, vector<8x32xf32>, vector<2x32xf32> -> vector<2x32xf32>
    %216 = vector.broadcast %4 : vector<1x32xf32> to vector<2x32xf32>
    %217 = arith.addf %215, %216 : vector<2x32xf32>
    %cst_68 = arith.constant dense<0.000000e+00> : vector<2x16xf32>
    %218 = tpu.matmul %217, %3, %cst_68 {dimension_numbers = #tpu.dot_dimension_numbers<[1], [0], [0], [1], [0, 0, 1, 1], [], []>} : vector<2x32xf32>, vector<32x16xf32>, vector<2x16xf32> -> vector<2x16xf32>
    %219 = vector.broadcast %5 : vector<1x16xf32> to vector<2x16xf32>
    %220 = arith.addf %218, %219 : vector<2x16xf32>
    %c0_69 = arith.constant 0 : index
    %c0_70 = arith.constant 0 : index
    %221 = vector.load %arg3[%c0_69, %c0_70] : memref<2x32xf32, #tpu.memory_space<vmem>>, vector<2x16xf32>
    tpu.vector_store %arg3[%c0_69, %c0_70], %220 {strides = array<i32>} : memref<2x32xf32, #tpu.memory_space<vmem>>, vector<2x16xf32>,
    %c0_71 = arith.constant 0 : index
    %c16_72 = arith.constant 16 : index
    %222 = vector.load %arg3[%c0_71, %c16_72] : memref<2x32xf32, #tpu.memory_space<vmem>>, vector<2x8xf32>
    tpu.vector_store %arg3[%c0_71, %c16_72], %214 {strides = array<i32>} : memref<2x32xf32, #tpu.memory_space<vmem>>, vector<2x8xf32>,
    %c0_73 = arith.constant 0 : index
    %c24_74 = arith.constant 24 : index
    %223 = vector.load %arg3[%c0_73, %c24_74] : memref<2x32xf32, #tpu.memory_space<vmem>>, vector<2x8xf32>
    tpu.vector_store %arg3[%c0_73, %c24_74], %212 {strides = array<i32>} : memref<2x32xf32, #tpu.memory_space<vmem>>, vector<2x8xf32>,
    return
  }
}

</mosaic_0001>

<bundles_post_ra>
// kernel: a_call__.1
= control target key start
LH: loop header
LB: loop body
LE: loop exit
PB: predicated region body
PF: predicated region fallthrough
CT: control target
= control target key end

     0   :  { %8 = vsyncpa [#allocation3], 0  ;;  %s1308_s12 = smov [#allocation2]   ;;  %s1465_s0 = inlined_call_operand.vmem [shape: s32[16,1], index: 0, kind: input, shape index: {}]   ;;  %s1466_s1 = inlined_call_operand.vmem [shape: f32[2,16], index: 1, kind: input, shape index: {}]   ;;  %s1467_s2 = inlined_call_operand.hbm [shape: f32[80,32], index: 2, kind: input, shape index: {}]   ;;  %s1468_s3 = inlined_call_operand.vmem [shape: f32[2,32], index: 3, kind: output, shape index: {}]  }
   0x1   :  { %s18_s13 = sshll.u32 %s1308_s12, 4  ;;  %s1284_s16 = scalar_lea.hbm %s1467_s2, 1280  ;;  %s19_s13 = int_to_ptr.vmem [resolvable:$true] %s18_s13 }
   0x2   :  { %p1285_p0 = scmp.ne.s32.totalorder %s1467_s2, %s1284_s16  ;;  %p1288_p1 = scmp.lt.u32.totalorder %s1284_s16, %s1467_s2 }
   0x4   :  { %p1290_p2 = pnand %p1288_p1, %p1285_p0 }
   0x6   :  { %1293 = shalt.err (!%p1290_p2)
}
   0x7   :  { %s1294_s21 = scalar_lea.vmem %s19_s13, 1280  ;;  %p1299_p4 = scmp.lt.s32.totalorder %s19_s13, %s19_s13 }
   0x8   :  { %p1295_p3 = scmp.ne.s32.totalorder %s19_s13, %s1294_s21  ;;  %p1300_p5 = scmp.lt.s32.totalorder %s1294_s21, %s1294_s21 }
   0xa   :  { %p1301_p6 = por %p1300_p5, %p1299_p4 }
   0xc   :  { %p1302_p7 = pnand %p1301_p6, %p1295_p3 }
   0xe   :  { %1305 = shalt.err (!%p1302_p7)
}
   0xf   :  { %s1309_s22 = smov 128   ;;  %s1310_s23 = smov 8  }
  0x10   :  { %24 = dma.hbm_to_vmem [thread:$0]  %s1467_s2, 1280, %s19_s13, [#allocation3], %s1309_s22, %s1309_s22, %s1310_s23  }
  0x11   :  { %1306 = dma.done.wait [#allocation3], 1280  }
  0x12   :  { %1307 = vsyncadd [#allocation3], 4294966016  ;;  %v1311_v0 = vmov 0   ;;  %v38_v1 = vld [vmem:[%s1465_s0] sm:$0xff]  ;;  %v29_v3 = vld [vmem:[#allocation2 + $0x8] sm:$0xff]  ;;  %v1312_v6 = vmov 0.0   ;;  %v40_v8 = vlaneseq }
  0x13   :  { %1251 = vset.pattern.permute.xlu0 %v1311_v0  ;;  %v28_v2 = vld [vmem:[#allocation2] sm:$0xff]  ;;  %v39_v4 = vld [vmem:[%s1465_s0 + $0x8] sm:$0xff]  ;;  %1179 = vmatprep.subr.mxu1 %v1312_v6  ;;  %v1360_v7 = vld [vmem:[#allocation2 + $0x10] sm:$0xff]  ;;  %vm1313_vm0 = vmmov 0   ;;  %vm54_vm1 = vcmask 130048   ;;  %vm137_vm4 = vcmask 64512  }
  0x14   :  { %43 = vperm.xlu0 %1251, %v38_v1   ;;  %v1230_v5 = vpack.c.bf16 %v29_v3, %v28_v2  ;;  %1180 = vmatpush3.msra.mxu1 %v1360_v7  ;;  %v41_v9 = vand.u32 127, %v40_v8  ;;  %v136_v14 = vld [vmem:[%s1466_s1] sm:$0x3]  ;;  %s1314_s1 = smov 112   ;;  %s1315_s30 = smov 16   ;;  %vm1032_vm5 = vcmask 261120  }
  0x15   :  { %1181 = vmatprep.mubr.msk.f32.mxu1 %vm1313_vm0, %v1312_v6  ;;  %1189 = vmatprep.subr.mxu1 %v1312_v6  ;;  %s1316_s4 = smov 104   ;;  %s1318_s5 = smov 120   ;;  %vm1106_vm6 = vcmask 123904   ;;  %vm1111_vm7 = vcmask 195718   ;;  %vm1117_vm8 = vcmask 261318  }
  0x16   :  { %1231 = vmatprep.subr.bf16.mxu0 %v1230_v5 }
  0x17   :  { %1233 = vmatpush3.bf16.msra.mxu0 %v1230_v5 }
  0x18   :  { %46 = vperm.xlu0 %1251, %v39_v4   ;;  %1174 = vmatprep.subr.mxu0 %v1312_v6 }
  0x93   :  { %v44_v10 = vpop.permute.xlu0 %43 }
  0x94   :  { %vm48_vm2 = vcmp.eq.s32.totalorder %v44_v10, %v41_v9 }
  0x95   :  { %v1124_v11 = vsel %vm48_vm2, 1.0, %v1312_v6 }
  0x96   :  { %1171 = vmatprep.mubr.msk.f32.mxu0 %vm54_vm1, %v1124_v11 }
  0x97   :  { %v47_v12 = vpop.permute.xlu0 %46 }
  0x98   :  { %vm49_vm3 = vcmp.eq.s32.totalorder %v47_v12, %v41_v9 }
  0x99   :  { %v1125_v13 = vsel %vm49_vm3, 1.0, %v1312_v6 }
  0x9a   :  { %1172 = vmatmul.mubr.msk.f32.vlgmr.msra.gmra.mrb[0].mxu0 %vm54_vm1, %v1125_v13 }
  0x9b   :  { %1175 = vmatpush3.msra.mxu0 %v1360_v7  ;;  %1176 = vmatprep.mubr.msk.f32.mxu0 %vm1313_vm0, %v1312_v6 }
  0x9c   :  { %1184 = vmatprep.subr.mxu0 %v1312_v6 }
  0x9e   :  { %1177 = vmatmul.mubr.msk.f32.vlgmr.msra.gmra.mrb[2].mxu0 %vm137_vm4, %v136_v14 }
  0x9f   :  { %1185 = vmatpush3.msra.mxu0 %v1360_v7  ;;  %1186 = vmatprep.mubr.msk.f32.mxu0 %vm1313_vm0, %v1312_v6 }
  0xa0   :  { %1194 = vmatprep.subr.mxu0 %v1312_v6 }
 0x16d   :  { %v1380_v15 = vpop.f32.mrb[0].mxu0 }
 0x16e   :  { %v1382_v16 = vpop.f32.mrb[1].mxu0 }
 0x171   :  { %v207_v17 = vpop.f32.mrb[2].mxu0 }
 0x172   :  { %v211_v18 = vadd.f32 %v207_v17, %v1382_v16  ;;  %v1178_v19 = vpop.f32.mrb[3].mxu0 }
 0x174   :  { %1252 = vtanh.f32 %v211_v18 }
 0x17e   :  { %v1253_v20 = vpop.eup %1252 }
 0x17f   :  { %217 = vrot.lane.b32.xlu1 %v1253_v20, %s1314_s1  ;;  %v213_v21 = vadd.f32 1.0, %v1253_v20 }
 0x181   :  { %v214_v22 = vmul.f32 0.5, %v213_v21 }
 0x183   :  { %v215_v25 = vmul.f32 %v214_v22, %v136_v14 }
 0x1f1   :  { %v218_v23 = vpop.permute.xlu1 %217 }
 0x1f2   :  { %v220_v24 = vmul.f32 %v218_v23, %v214_v22 }
 0x1f4   :  { %222 = vrot.lane.b32.xlu1 %v220_v24, %s1310_s23 }
 0x266   :  { %v223_v26 = vpop.permute.xlu1 %222 }
 0x267   :  { %v225_v27 = vadd.f32 %v223_v26, %v215_v25 }
 0x269   :  { %1254 = vtanh.f32 %v225_v27  ;;  %v315_v41 = vrot.slane %v225_v27, 6 }
 0x273   :  { %v1255_v28 = vpop.eup %1254 }
 0x274   :  { %228 = vrot.lane.b32.xlu0 %v1255_v28, %s1315_s30 }
 0x2e6   :  { %v229_v29 = vpop.permute.xlu0 %228 }
 0x2e7   :  { %v231_v30 = vmul.f32 %v229_v29, %v214_v22 }
 0x2e9   :  { %233 = vrot.lane.b32.xlu1 %v231_v30, %s1316_s4 }
 0x35b   :  { %v234_v31 = vpop.permute.xlu1 %233 }
 0x35c   :  { %1182 = vmatmul.mubr.msk.f32.vlgmr.msra.gmra.mrb[0].mxu1 %vm137_vm4, %v234_v31 }
 0x35d   :  { %1190 = vmatpush3.msra.mxu1 %v1360_v7  ;;  %1191 = vmatprep.mubr.msk.f32.mxu1 %vm1313_vm0, %v1312_v6 }
 0x35e   :  { %1199 = vmatprep.subr.mxu1 %v1312_v6 }
 0x42f   :  { %v303_v32 = vpop.f32.mrb[0].mxu1 }
 0x430   :  { %v308_v33 = vrot.slane %v303_v32, 6  ;;  %v1183_v34 = vpop.f32.mrb[1].mxu1 }
 0x432   :  { %v310_v35 = vadd.f32 %v308_v33, %v1382_v16 }
 0x434   :  { %1256 = vtanh.f32 %v310_v35 }
 0x43e   :  { %v1257_v36 = vpop.eup %1256 }
 0x43f   :  { %319 = vrot.lane.b32.xlu0 %v1257_v36, %s1314_s1  ;;  %v312_v37 = vadd.f32 1.0, %v1257_v36 }
 0x441   :  { %v313_v38 = vmul.f32 0.5, %v312_v37 }
 0x443   :  { %v317_v42 = vmul.f32 %v315_v41, %v313_v38 }
 0x4b1   :  { %v320_v39 = vpop.permute.xlu0 %319 }
 0x4b2   :  { %v322_v40 = vmul.f32 %v320_v39, %v313_v38 }
 0x4b4   :  { %324 = vrot.lane.b32.xlu1 %v322_v40, %s1310_s23 }
 0x526   :  { %v325_v43 = vpop.permute.xlu1 %324 }
 0x527   :  { %v327_v44 = vadd.f32 %v325_v43, %v317_v42 }
 0x529   :  { %1258 = vtanh.f32 %v327_v44  ;;  %v418_v59 = vrot.slane %v327_v44, 6 }
 0x533   :  { %v1259_v45 = vpop.eup %1258 }
 0x534   :  { %330 = vrot.lane.b32.xlu0 %v1259_v45, %s1315_s30 }
 0x5a6   :  { %v331_v46 = vpop.permute.xlu0 %330 }
 0x5a7   :  { %v333_v47 = vmul.f32 %v331_v46, %v313_v38 }
 0x5a9   :  { %v335_v48 = vrot.slane %v333_v47, 2 }
 0x5ab   :  { %336 = vrot.lane.b32.xlu1 %v335_v48, %s1316_s4 }
 0x61d   :  { %v337_v49 = vpop.permute.xlu1 %336 }
 0x61e   :  { %1187 = vmatmul.mubr.msk.f32.vlgmr.msra.gmra.mrb[4].mxu0 %vm137_vm4, %v337_v49 }
 0x61f   :  { %1195 = vmatpush3.msra.mxu0 %v1360_v7  ;;  %1196 = vmatprep.mubr.msk.f32.mxu0 %vm1313_vm0, %v1312_v6 }
 0x620   :  { %1204 = vmatprep.subr.mxu0 %v1312_v6 }
 0x6f1   :  { %v406_v50 = vpop.f32.mrb[4].mxu0 }
 0x6f2   :  { %v411_v51 = vrot.slane %v406_v50, 4  ;;  %v1188_v52 = vpop.f32.mrb[5].mxu0 }
 0x6f4   :  { %v413_v53 = vadd.f32 %v411_v51, %v1382_v16 }
 0x6f6   :  { %1260 = vtanh.f32 %v413_v53 }
 0x700   :  { %v1261_v54 = vpop.eup %1260 }
 0x701   :  { %422 = vrot.lane.b32.xlu0 %v1261_v54, %s1314_s1  ;;  %v415_v55 = vadd.f32 1.0, %v1261_v54 }
 0x703   :  { %v416_v56 = vmul.f32 0.5, %v415_v55 }
 0x705   :  { %v420_v60 = vmul.f32 %v418_v59, %v416_v56 }
 0x773   :  { %v423_v57 = vpop.permute.xlu0 %422 }
 0x774   :  { %v425_v58 = vmul.f32 %v423_v57, %v416_v56 }
 0x776   :  { %427 = vrot.lane.b32.xlu1 %v425_v58, %s1310_s23 }
 0x7e8   :  { %v428_v61 = vpop.permute.xlu1 %427 }
 0x7e9   :  { %v430_v62 = vadd.f32 %v428_v61, %v420_v60 }
 0x7eb   :  { %1262 = vtanh.f32 %v430_v62  ;;  %v521_v17 = vrot.slane %v430_v62, 6 }
 0x7f5   :  { %v1263_v63 = vpop.eup %1262 }
 0x7f6   :  { %433 = vrot.lane.b32.xlu0 %v1263_v63, %s1315_s30 }
 0x868   :  { %v434_v0 = vpop.permute.xlu0 %433 }
 0x869   :  { %v436_v1 = vmul.f32 %v434_v0, %v416_v56 }
 0x86b   :  { %v438_v2 = vrot.slane %v436_v1, 4 }
 0x86d   :  { %439 = vrot.lane.b32.xlu1 %v438_v2, %s1316_s4 }
 0x8df   :  { %v440_v3 = vpop.permute.xlu1 %439 }
 0x8e0   :  { %1192 = vmatmul.mubr.msk.f32.vlgmr.msra.gmra.mrb[2].mxu1 %vm137_vm4, %v440_v3 }
 0x8e1   :  { %1200 = vmatpush3.msra.mxu1 %v1360_v7  ;;  %1201 = vmatprep.mubr.msk.f32.mxu1 %vm1313_vm0, %v1312_v6 }
 0x8e2   :  { %1209 = vmatprep.subr.mxu1 %v1312_v6 }
 0x9b3   :  { %v509_v4 = vpop.f32.mrb[2].mxu1 }
 0x9b4   :  { %v514_v5 = vrot.slane %v509_v4, 2  ;;  %v1193_v8 = vpop.f32.mrb[3].mxu1 }
 0x9b6   :  { %v516_v9 = vadd.f32 %v514_v5, %v1382_v16 }
 0x9b8   :  { %1264 = vtanh.f32 %v516_v9 }
 0x9c2   :  { %v1265_v10 = vpop.eup %1264 }
 0x9c3   :  { %525 = vrot.lane.b32.xlu0 %v1265_v10, %s1314_s1  ;;  %v518_v11 = vadd.f32 1.0, %v1265_v10 }
 0x9c5   :  { %v519_v12 = vmul.f32 0.5, %v518_v11 }
 0x9c7   :  { %v523_v18 = vmul.f32 %v521_v17, %v519_v12 }
 0xa35   :  { %v526_v13 = vpop.permute.xlu0 %525 }
 0xa36   :  { %v528_v14 = vmul.f32 %v526_v13, %v519_v12 }
 0xa38   :  { %530 = vrot.lane.b32.xlu1 %v528_v14, %s1310_s23 }
 0xaaa   :  { %v531_v19 = vpop.permute.xlu1 %530 }
 0xaab   :  { %v533_v20 = vadd.f32 %v531_v19, %v523_v18 }
 0xaad   :  { %1266 = vtanh.f32 %v533_v20  ;;  %v621_v33 = vrot.slane %v533_v20, 6 }
 0xab7   :  { %v1267_v21 = vpop.eup %1266 }
 0xab8   :  { %536 = vrot.lane.b32.xlu0 %v1267_v21, %s1315_s30 }
 0xb2a   :  { %v537_v22 = vpop.permute.xlu0 %536 }
 0xb2b   :  { %v539_v16 = vmul.f32 %v537_v22, %v519_v12 }
 0xb2d   :  { %v541_v23 = vrot.slane %v539_v16, 6 }
 0xb2f   :  { %542 = vrot.lane.b32.xlu1 %v541_v23, %s1316_s4 }
 0xba1   :  { %v543_v24 = vpop.permute.xlu1 %542 }
 0xba2   :  { %1197 = vmatmul.mubr.msk.f32.vlgmr.msra.gmra.mrb[6].mxu0 %vm137_vm4, %v543_v24 }
 0xba3   :  { %1205 = vmatpush3.msra.mxu0 %v1360_v7  ;;  %1206 = vmatprep.mubr.msk.f32.mxu0 %vm1313_vm0, %v1312_v6 }
 0xba4   :  { %1214 = vmatprep.subr.mxu0 %v1312_v6 }
 0xc75   :  { %v612_v25 = vpop.f32.mrb[6].mxu0 }
 0xc76   :  { %v616_v26 = vadd.f32 %v1380_v15, %v612_v25  ;;  %v1198_v27 = vpop.f32.mrb[7].mxu0 }
 0xc78   :  { %1268 = vtanh.f32 %v616_v26 }
 0xc82   :  { %v1269_v28 = vpop.eup %1268 }
 0xc83   :  { %625 = vrot.lane.b32.xlu0 %v1269_v28, %s1314_s1  ;;  %v618_v29 = vadd.f32 1.0, %v1269_v28 }
 0xc85   :  { %v619_v30 = vmul.f32 0.5, %v618_v29  ;;  %v33_v29 = vld [vmem:[#allocation2 + $0x28] sm:$0xff] }
 0xc87   :  { %v623_v34 = vmul.f32 %v621_v33, %v619_v30 }
 0xcf5   :  { %v626_v31 = vpop.permute.xlu0 %625 }
 0xcf6   :  { %v628_v32 = vmul.f32 %v626_v31, %v619_v30 }
 0xcf8   :  { %630 = vrot.lane.b32.xlu1 %v628_v32, %s1310_s23 }
 0xd6a   :  { %v631_v35 = vpop.permute.xlu1 %630 }
 0xd6b   :  { %v633_v36 = vadd.f32 %v631_v35, %v623_v34 }
 0xd6d   :  { %1270 = vtanh.f32 %v633_v36  ;;  %v723_v50 = vrot.slane %v633_v36, 6  ;;  %v34_v36 = vld [vmem:[#allocation2 + $0x30] sm:$0xff] }
 0xd77   :  { %v1271_v37 = vpop.eup %1270 }
 0xd78   :  { %636 = vrot.lane.b32.xlu0 %v1271_v37, %s1315_s30  ;;  %v35_v37 = vld [vmem:[#allocation2 + $0x38] sm:$0xff] }
 0xdea   :  { %v637_v38 = vpop.permute.xlu0 %636 }
 0xdeb   :  { %v639_v39 = vmul.f32 %v637_v38, %v619_v30  ;;  %v1317_v30 = vmov 0.0|0.0   ;;  %v1238_v38 = vpack.c.bf16 %v35_v37, %v34_v36 }
 0xded   :  { %641 = vrot.lane.b32.xlu1 %v639_v39, %s1316_s4  ;;  %v1136_v39 = vld [vmem:[#allocation2 + $0x40] ss:$0 sm:$0xff] }
 0xe5f   :  { %v642_v40 = vpop.permute.xlu1 %641 }
 0xe60   :  { %1202 = vmatmul.mubr.msk.f32.vlgmr.msra.gmra.mrb[4].mxu1 %vm137_vm4, %v642_v40 }
 0xe61   :  { %1210 = vmatpush3.msra.mxu1 %v1360_v7  ;;  %1211 = vmatprep.mubr.msk.f32.mxu1 %vm1313_vm0, %v1312_v6 }
 0xe62   :  { %1234 = vmatprep.subr.bf16.mxu1 %v1317_v30 }
 0xf33   :  { %v711_v41 = vpop.f32.mrb[4].mxu1 }
 0xf34   :  { %v716_v42 = vrot.slane %v711_v41, 6  ;;  %v1203_v43 = vpop.f32.mrb[5].mxu1 }
 0xf35   :  { %v1138_v43 = vld [vmem:[#allocation2 + $0x48] ss:$0 sm:$0xff] }
 0xf36   :  { %v718_v44 = vadd.f32 %v1380_v15, %v716_v42 }
 0xf38   :  { %1272 = vtanh.f32 %v718_v44 }
 0xf42   :  { %v1273_v45 = vpop.eup %1272 }
 0xf43   :  { %727 = vrot.lane.b32.xlu0 %v1273_v45, %s1314_s1  ;;  %v720_v46 = vadd.f32 1.0, %v1273_v45 }
 0xf45   :  { %v721_v47 = vmul.f32 0.5, %v720_v46 }
 0xf47   :  { %v725_v7 = vmul.f32 %v723_v50, %v721_v47 }
 0xfb5   :  { %v728_v48 = vpop.permute.xlu0 %727 }
 0xfb6   :  { %v730_v49 = vmul.f32 %v728_v48, %v721_v47 }
 0xfb8   :  { %732 = vrot.lane.b32.xlu1 %v730_v49, %s1310_s23 }
0x102a   :  { %v733_v51 = vpop.permute.xlu1 %732 }
0x102b   :  { %v735_v52 = vadd.f32 %v733_v51, %v725_v7 }
0x102d   :  { %1274 = vtanh.f32 %v735_v52  ;;  %v826_v3 = vrot.slane %v735_v52, 6 }
0x1037   :  { %v1275_v53 = vpop.eup %1274 }
0x1038   :  { %738 = vrot.lane.b32.xlu0 %v1275_v53, %s1315_s30 }
0x10aa   :  { %v739_v54 = vpop.permute.xlu0 %738 }
0x10ab   :  { %v741_v55 = vmul.f32 %v739_v54, %v721_v47 }
0x10ad   :  { %v743_v56 = vrot.slane %v741_v55, 2 }
0x10af   :  { %744 = vrot.lane.b32.xlu1 %v743_v56, %s1316_s4 }
0x1121   :  { %v745_v57 = vpop.permute.xlu1 %744 }
0x1122   :  { %1207 = vmatmul.mubr.msk.f32.vlgmr.msra.gmra.mrb[8].mxu0 %vm137_vm4, %v745_v57 }
0x1123   :  { %1216 = vmatprep.mubr.msk.f32.mxu0 %vm1313_vm0, %v1312_v6 }
0x11f5   :  { %v814_v58 = vpop.f32.mrb[8].mxu0 }
0x11f6   :  { %v819_v59 = vrot.slane %v814_v58, 4  ;;  %v1208_v60 = vpop.f32.mrb[9].mxu0 }
0x11f8   :  { %v821_v61 = vadd.f32 %v1380_v15, %v819_v59 }
0x11fa   :  { %1276 = vtanh.f32 %v821_v61 }
0x1204   :  { %v1277_v62 = vpop.eup %1276 }
0x1205   :  { %830 = vrot.lane.b32.xlu0 %v1277_v62, %s1314_s1  ;;  %v823_v63 = vadd.f32 1.0, %v1277_v62 }
0x1207   :  { %v824_v0 = vmul.f32 0.5, %v823_v63 }
0x1209   :  { %v828_v4 = vmul.f32 %v826_v3, %v824_v0 }
0x1277   :  { %v831_v1 = vpop.permute.xlu0 %830 }
0x1278   :  { %v833_v2 = vmul.f32 %v831_v1, %v824_v0 }
0x127a   :  { %835 = vrot.lane.b32.xlu1 %v833_v2, %s1310_s23 }
0x12ec   :  { %v836_v5 = vpop.permute.xlu1 %835 }
0x12ed   :  { %v838_v8 = vadd.f32 %v836_v5, %v828_v4 }
0x12ef   :  { %1278 = vtanh.f32 %v838_v8  ;;  %v929_v24 = vrot.slane %v838_v8, 6 }
0x12f9   :  { %v1279_v9 = vpop.eup %1278 }
0x12fa   :  { %841 = vrot.lane.b32.xlu0 %v1279_v9, %s1315_s30 }
0x136c   :  { %v842_v10 = vpop.permute.xlu0 %841 }
0x136d   :  { %v844_v11 = vmul.f32 %v842_v10, %v824_v0 }
0x136f   :  { %v846_v12 = vrot.slane %v844_v11, 4 }
0x1371   :  { %847 = vrot.lane.b32.xlu1 %v846_v12, %s1316_s4 }
0x13e3   :  { %v848_v13 = vpop.permute.xlu1 %847 }
0x13e4   :  { %1212 = vmatmul.mubr.msk.f32.vlgmr.msra.gmra.mrb[6].mxu1 %vm137_vm4, %v848_v13 }
0x13e5   :  { %1227 = vmatprep.mubr.msk.f32.mxu1 %vm1313_vm0, %v1312_v6  ;;  %v31_v6 = vld [vmem:[#allocation2 + $0x18] sm:$0xff] }
0x13e6   :  { %1215 = vmatpush3.msra.mxu0 %v31_v6 }
0x14b7   :  { %v917_v14 = vpop.f32.mrb[6].mxu1 }
0x14b8   :  { %v922_v17 = vrot.slane %v917_v14, 2  ;;  %v1213_v18 = vpop.f32.mrb[7].mxu1 }
0x14ba   :  { %v924_v19 = vadd.f32 %v1380_v15, %v922_v17  ;;  %v32_v15 = vld [vmem:[#allocation2 + $0x20] sm:$0xff] }
0x14bb   :  { %v1235_v31 = vpack.c.bf16 %v33_v29, %v32_v15 }
0x14bc   :  { %1280 = vtanh.f32 %v924_v19 }
0x14bd   :  { %1236 = vmatpush3.bf16.msra.mxu1 %v1235_v31 }
0x14be   :  { %1237 = vmatprep.subr.bf16.mxu1 %v1317_v30 }
0x14c1   :  { %1239 = vmatpush3.bf16.msra.mxu1 %v1238_v38 }
0x14c6   :  { %v1281_v20 = vpop.eup %1280 }
0x14c7   :  { %933 = vrot.lane.b32.xlu0 %v1281_v20, %s1314_s1  ;;  %v926_v21 = vadd.f32 1.0, %v1281_v20 }
0x14c9   :  { %v927_v22 = vmul.f32 0.5, %v926_v21 }
0x14cb   :  { %v931_v25 = vmul.f32 %v929_v24, %v927_v22 }
0x1539   :  { %v934_v16 = vpop.permute.xlu0 %933 }
0x153a   :  { %v936_v23 = vmul.f32 %v934_v16, %v927_v22 }
0x153c   :  { %938 = vrot.lane.b32.xlu1 %v936_v23, %s1310_s23 }
0x15ae   :  { %v939_v26 = vpop.permute.xlu1 %938 }
0x15af   :  { %v941_v27 = vadd.f32 %v939_v26, %v931_v25 }
0x15b1   :  { %1282 = vtanh.f32 %v941_v27 }
0x15bb   :  { %v1283_v28 = vpop.eup %1282 }
0x15bc   :  { %944 = vrot.lane.b32.xlu0 %v1283_v28, %s1315_s30 }
0x162e   :  { %v945_v32 = vpop.permute.xlu0 %944 }
0x162f   :  { %v947_v33 = vmul.f32 %v945_v32, %v927_v22 }
0x1631   :  { %v953_v34 = vrot.slane %v947_v33, 6  ;;  %1108 = vrot.lane.b32.xlu0 %v947_v33, %s1318_s5 }
0x1633   :  { %954 = vrot.lane.b32.xlu1 %v953_v34, %s1316_s4 }
0x1637   :  { %1114 = vrot.lane.b32.xlu1 %v941_v27, %s1315_s30 }
0x16a3   :  { %v1109_v47 = vpop.permute.xlu0 %1108 }
0x16a5   :  { %v955_v35 = vpop.permute.xlu1 %954 }
0x16a6   :  { %1217 = vmatmul.mubr.msk.f32.vlgmr.msra.gmra.mrb[10].mxu0 %vm137_vm4, %v955_v35 }
0x16a9   :  { %v1115_v48 = vpop.permute.xlu1 %1114 }
0x1779   :  { %v1024_v40 = vpop.f32.mrb[10].mxu0 }
0x177a   :  { %v1025_v41 = vadd.f32 %v1136_v39, %v1024_v40  ;;  %v1218_v42 = vpop.f32.mrb[11].mxu0 }
0x177c   :  { %1228 = vmatmul.mubr.msk.f32.vlgmr.msra.gmra.mrb[8].mxu1 %vm1032_vm5, %v1025_v41 }
0x184f   :  { %v1102_v44 = vpop.f32.mrb[8].mxu1 }
0x1850   :  { %v1103_v45 = vadd.f32 %v1138_v43, %v1102_v44  ;;  %v1229_v46 = vpop.f32.mrb[9].mxu1 }
0x1852   :  { %1107 = vst.msk [vmem:[%s1468_s3] sm:$0x3] %vm1106_vm6, %v1103_v45 }
0x1853   :  { %1112 = vst.msk [vmem:[%s1468_s3 - $0x6] sm:$0xc0] %vm1111_vm7, %v1109_v47 }
0x1854   :  { %1118 = vst.msk [vmem:[%s1468_s3 - $0x6] sm:$0xc0] %vm1117_vm8, %v1115_v48 }
0x1855   :  { %1123 = vsyncpa [#allocation3], 1 }

</bundles_post_ra>
